<compile_context>
chip_gen: v6e
topology: v6e:2x2x1
jax: 0.10.0
libtpu: 0.0.40
codegen_flags: <defaults>
</compile_context>

<pallas_src>
import jax
import jax.numpy as jnp
from jax.experimental import pallas as pl
from jax.experimental.pallas import tpu as pltpu


def _se_kernel_cfirst(x_ref, w1_ref, b1_ref, w2_ref, b2_ref, o_ref):
    # x block: (Bt, C, HW) — channels on sublanes, flattened spatial on lanes.
    x = x_ref[...]                                                  # (Bt, C, HW)
    # Squeeze: global average pool over the spatial (lane) axis, accumulated in f32.
    pooled = jnp.mean(x.astype(jnp.float32), axis=2)                # (Bt, C)
    # Excitation: Linear -> ReLU -> Linear -> Sigmoid (f32 on the tiny FC path).
    h = jnp.dot(pooled, w1_ref[...], preferred_element_type=jnp.float32) + b1_ref[...]
    h = jnp.maximum(h, 0.0)                                         # (Bt, C_red)
    z = jnp.dot(h, w2_ref[...], preferred_element_type=jnp.float32) + b2_ref[...]
    y = jax.nn.sigmoid(z)                                           # (Bt, C)
    # Scale: channel gate broadcast over spatial; multiply in x's dtype
    # (no full-block f32 up-cast/down-cast on the store path).
    o_ref[...] = (x * y.astype(x.dtype)[:, :, None]).astype(o_ref.dtype)


def _se_kernel_clast(x_ref, w1_ref, b1_ref, w2_ref, b2_ref, o_ref):
    # x block: (Bt, HW, C) — channels on lanes (lane-dense when C >= 128).
    x = x_ref[...]                                                  # (Bt, HW, C)
    pooled = jnp.mean(x.astype(jnp.float32), axis=1)                # (Bt, C)
    h = jnp.dot(pooled, w1_ref[...], preferred_element_type=jnp.float32) + b1_ref[...]
    h = jnp.maximum(h, 0.0)                                         # (Bt, C_red)
    z = jnp.dot(h, w2_ref[...], preferred_element_type=jnp.float32) + b2_ref[...]
    y = jax.nn.sigmoid(z)                                           # (Bt, C)
    o_ref[...] = (x * y.astype(x.dtype)[:, None, :]).astype(o_ref.dtype)


def se_layer(x_nchw, w1, b1, w2, b2):
    """SELayer forward.

    x_nchw: (B, C, H, W); w1: (C, C_red); b1: (1, C_red); w2: (C_red, C); b2: (1, C).
    Matches the PyTorch module: x * sigmoid(fc2(relu(fc1(avgpool(x))))).
    """
    B, C, H, W = x_nchw.shape
    HW = H * W
    C_red = w1.shape[1]
    itemsize = x_nchw.dtype.itemsize

    # --- choose the batch fold Bt ---------------------------------------
    per_batch_bytes = C * HW * itemsize
    target_block_bytes = 1 << 20            # ~1 MiB per x block (roofline-sized)
    max_block_bytes = 12 << 20              # keep in+out double-buffers << 64 MiB (v7x)
    bt = max(1, target_block_bytes // max(per_batch_bytes, 1))
    bt = min(bt, B)
    while B % bt != 0:
        bt -= 1
    while bt > 1 and bt * per_batch_bytes > max_block_bytes:
        bt -= 1
        while B % bt != 0:
            bt -= 1
    # Keep a few grid steps so megacore (v7x) sharding + DMA/compute overlap work.
    min_steps = min(B, 4)
    while bt > 1 and (B // bt) < min_steps:
        bt -= 1
        while B % bt != 0:
            bt -= 1

    # --- choose layout: lane-dense channels-last when C is wide ----------
    channels_last = C >= 128
    if channels_last:
        x = x_nchw.reshape(B, C, HW).transpose(0, 2, 1)   # (B, HW, C)
        kern = _se_kernel_clast
        blk = (bt, HW, C)
    else:
        x = x_nchw.reshape(B, C, HW)                      # (B, C, HW)
        kern = _se_kernel_cfirst
        blk = (bt, C, HW)

    grid = (B // bt,)

    # --- VMEM budget: 2 double-buffered slabs (in + out) + tiny weights ---
    block_bytes = bt * per_batch_bytes
    weight_bytes = (C * C_red + C_red + C_red * C + C) * 4
    vmem_limit = int(min(48 << 20, max(32 << 20, 4 * block_bytes + weight_bytes + (2 << 20))))

    # Memory-bound cost hint for the XLA scheduler.
    cost = pl.CostEstimate(
        flops=int(4 * B * C * C_red + 2 * B * C * HW),
        transcendentals=int(B * C),
        bytes_accessed=int(2 * B * C * HW * itemsize + weight_bytes),
    )

    out = pl.pallas_call(
        kern,
        out_shape=jax.ShapeDtypeStruct(x.shape, x.dtype),
        grid_spec=pltpu.PrefetchScalarGridSpec(
            num_scalar_prefetch=0,
            grid=grid,
            in_specs=[
                pl.BlockSpec(blk, lambda b: (b, 0, 0)),
                pl.BlockSpec((C, C_red), lambda b: (0, 0)),
                pl.BlockSpec((1, C_red), lambda b: (0, 0)),
                pl.BlockSpec((C_red, C), lambda b: (0, 0)),
                pl.BlockSpec((1, C), lambda b: (0, 0)),
            ],
            out_specs=pl.BlockSpec(blk, lambda b: (b, 0, 0)),
        ),
        compiler_params=pltpu.CompilerParams(
            dimension_semantics=("parallel",),
            vmem_limit_bytes=vmem_limit,
        ),
        cost_estimate=cost,
    )(x, w1, b1, w2, b2)

    if channels_last:
        return out.transpose(0, 2, 1).reshape(B, C, H, W)
    return out.reshape(B, C, H, W)


def se_layer_ref(x, w1, b1, w2, b2):
    """Pure-JAX reference matching the PyTorch forward."""
    y = jnp.mean(x, axis=(2, 3))                 # (B, C)
    y = jnp.maximum(y @ w1 + b1, 0.0)            # (B, C_red)
    y = jax.nn.sigmoid(y @ w2 + b2)              # (B, C)
    return x * y[:, :, None, None]


if __name__ == "__main__":
    # Small shapes consistent with SELayer(channel=64, reduction=16)
    B, C, H, W = 2, 64, 8, 8
    reduction = 16
    C_red = C // reduction

    key = jax.random.PRNGKey(0)
    kx, kw1, kb1, kw2, kb2 = jax.random.split(key, 5)

    x = jax.random.normal(kx, (B, C, H, W), dtype=jnp.float32)
    # Parameter shapes follow nn.Linear(C, C//r) and nn.Linear(C//r, C).
    w1 = jax.random.normal(kw1, (C, C_red), dtype=jnp.float32) * 0.1
    b1 = jax.random.normal(kb1, (1, C_red), dtype=jnp.float32) * 0.1
    w2 = jax.random.normal(kw2, (C_red, C), dtype=jnp.float32) * 0.1
    b2 = jax.random.normal(kb2, (1, C), dtype=jnp.float32) * 0.1

    out = se_layer(x, w1, b1, w2, b2)
    out = jax.block_until_ready(out)

    ref = se_layer_ref(x, w1, b1, w2, b2)
    assert out.shape == (B, C, H, W)
    assert jnp.allclose(out, ref, atol=1e-5, rtol=1e-5)

    print("KERNEL_OK")
</pallas_src>

<mosaic_0001>
module attributes {stable_mosaic.version = 11 : i64} {
  func.func @_se_kernel_cfirst(%arg0: i32, %arg1: memref<1x64x64xf32, #tpu.memory_space<vmem>>, %arg2: memref<64x4xf32, #tpu.memory_space<vmem>>, %arg3: memref<1x4xf32, #tpu.memory_space<vmem>>, %arg4: memref<4x64xf32, #tpu.memory_space<vmem>>, %arg5: memref<1x64xf32, #tpu.memory_space<vmem>>, %arg6: memref<1x64x64xf32, #tpu.memory_space<vmem>>) attributes {dimension_semantics = [#tpu.dimension_semantics<parallel>], iteration_bounds = array<i64: 2>, scalar_prefetch = 0 : i64, scratch_operands = 0 : i64, tpu.core_type = #tpu.core_type<tc>, window_params = [{transform_indices = @transform_0, window_bounds = array<i64: 1, 64, 64>}, {pipeline_mode = #tpu.pipeline_mode<synchronous>, transform_indices = @transform_1, window_bounds = array<i64: 64, 4>}, {pipeline_mode = #tpu.pipeline_mode<synchronous>, transform_indices = @transform_2, window_bounds = array<i64: 1, 4>}, {pipeline_mode = #tpu.pipeline_mode<synchronous>, transform_indices = @transform_3, window_bounds = array<i64: 4, 64>}, {pipeline_mode = #tpu.pipeline_mode<synchronous>, transform_indices = @transform_4, window_bounds = array<i64: 1, 64>}, {transform_indices = @transform_5, window_bounds = array<i64: 1, 64, 64>}]} {
    %c0 = arith.constant 0 : index
    %c0_0 = arith.constant 0 : index
    %c0_1 = arith.constant 0 : index
    %0 = vector.load %arg1[%c0, %c0_0, %c0_1] : memref<1x64x64xf32, #tpu.memory_space<vmem>>, vector<1x64x64xf32>
    %cst = arith.constant dense<0.000000e+00> : vector<1x64xf32>
    %1 = vector.multi_reduction <add>, %0, %cst [2] : vector<1x64x64xf32> to vector<1x64xf32>
    %cst_2 = arith.constant 6.400000e+01 : f32
    %2 = vector.broadcast %cst_2 : f32 to vector<1x64xf32>
    %3 = arith.divf %1, %2 : vector<1x64xf32>
    %c0_3 = arith.constant 0 : index
    %c0_4 = arith.constant 0 : index
    %4 = vector.load %arg2[%c0_3, %c0_4] : memref<64x4xf32, #tpu.memory_space<vmem>>, vector<64x4xf32>
    %cst_5 = arith.constant dense<0.000000e+00> : vector<1x4xf32>
    %5 = tpu.matmul %3, %4, %cst_5 {dimension_numbers = #tpu.dot_dimension_numbers<[1], [0], [0], [1], [0, 0, 1, 1], [], []>} : vector<1x64xf32>, vector<64x4xf32>, vector<1x4xf32> -> vector<1x4xf32>
    %c0_6 = arith.constant 0 : index
    %c0_7 = arith.constant 0 : index
    %6 = vector.load %arg3[%c0_6, %c0_7] : memref<1x4xf32, #tpu.memory_space<vmem>>, vector<1x4xf32>
    %7 = arith.addf %5, %6 : vector<1x4xf32>
    %cst_8 = arith.constant 0.000000e+00 : f32
    %8 = vector.broadcast %cst_8 : f32 to vector<1x4xf32>
    %9 = arith.maximumf %7, %8 : vector<1x4xf32>
    %c0_9 = arith.constant 0 : index
    %c0_10 = arith.constant 0 : index
    %10 = vector.load %arg4[%c0_9, %c0_10] : memref<4x64xf32, #tpu.memory_space<vmem>>, vector<4x64xf32>
    %cst_11 = arith.constant dense<0.000000e+00> : vector<1x64xf32>
    %11 = tpu.matmul %9, %10, %cst_11 {dimension_numbers = #tpu.dot_dimension_numbers<[1], [0], [0], [1], [0, 0, 1, 1], [], []>} : vector<1x4xf32>, vector<4x64xf32>, vector<1x64xf32> -> vector<1x64xf32>
    %c0_12 = arith.constant 0 : index
    %c0_13 = arith.constant 0 : index
    %12 = vector.load %arg5[%c0_12, %c0_13] : memref<1x64xf32, #tpu.memory_space<vmem>>, vector<1x64xf32>
    %13 = arith.addf %11, %12 : vector<1x64xf32>
    %14 = arith.negf %13 : vector<1x64xf32>
    %15 = math.exp %14 : vector<1x64xf32>
    %cst_14 = arith.constant 1.000000e+00 : f32
    %16 = vector.broadcast %cst_14 : f32 to vector<1x64xf32>
    %17 = arith.addf %16, %15 : vector<1x64xf32>
    %18 = arith.divf %16, %17 : vector<1x64xf32>
    %19 = vector.shape_cast %18 : vector<1x64xf32> to vector<1x64x1xf32>
    %20 = vector.broadcast %19 : vector<1x64x1xf32> to vector<1x64x64xf32>
    %21 = arith.mulf %0, %20 : vector<1x64x64xf32>
    %c0_15 = arith.constant 0 : index
    %c0_16 = arith.constant 0 : index
    %c0_17 = arith.constant 0 : index
    %22 = vector.load %arg6[%c0_15, %c0_16, %c0_17] : memref<1x64x64xf32, #tpu.memory_space<vmem>>, vector<1x64x64xf32>
    tpu.vector_store %arg6[%c0_15, %c0_16, %c0_17], %21 {strides = array<i32>} : memref<1x64x64xf32, #tpu.memory_space<vmem>>, vector<1x64x64xf32>,
    return
  }
  func.func @transform_0(%arg0: i32) -> (i32, i32, i32) {
    %c0_i32 = arith.constant 0 : i32
    %c0_i32_0 = arith.constant 0 : i32
    %c0_i32_1 = arith.constant 0 : i32
    return %arg0, %c0_i32, %c0_i32_0 : i32, i32, i32
  }
  func.func @transform_1(%arg0: i32) -> (i32, i32) {
    %c0_i32 = arith.constant 0 : i32
    %c0_i32_0 = arith.constant 0 : i32
    %c0_i32_1 = arith.constant 0 : i32
    return %c0_i32, %c0_i32_0 : i32, i32
  }
  func.func @transform_2(%arg0: i32) -> (i32, i32) {
    %c0_i32 = arith.constant 0 : i32
    %c0_i32_0 = arith.constant 0 : i32
    %c0_i32_1 = arith.constant 0 : i32
    return %c0_i32, %c0_i32_0 : i32, i32
  }
  func.func @transform_3(%arg0: i32) -> (i32, i32) {
    %c0_i32 = arith.constant 0 : i32
    %c0_i32_0 = arith.constant 0 : i32
    %c0_i32_1 = arith.constant 0 : i32
    return %c0_i32, %c0_i32_0 : i32, i32
  }
  func.func @transform_4(%arg0: i32) -> (i32, i32) {
    %c0_i32 = arith.constant 0 : i32
    %c0_i32_0 = arith.constant 0 : i32
    %c0_i32_1 = arith.constant 0 : i32
    return %c0_i32, %c0_i32_0 : i32, i32
  }
  func.func @transform_5(%arg0: i32) -> (i32, i32, i32) {
    %c0_i32 = arith.constant 0 : i32
    %c0_i32_0 = arith.constant 0 : i32
    %c0_i32_1 = arith.constant 0 : i32
    return %arg0, %c0_i32, %c0_i32_0 : i32, i32, i32
  }
}

</mosaic_0001>

<bundles_post_ra>
// kernel: tpu_custom_call.1
= control target key start
LH: loop header
LB: loop body
LE: loop exit
PB: predicated region body
PF: predicated region fallthrough
CT: control target
= control target key end

     0   :  { %10 = vsyncpa [#allocation3], 0  ;;  %s1148_s0 = inlined_call_operand.hbm [shape: f32[2,64,64], index: 0, kind: input, shape index: {}]   ;;  %s1149_s1 = inlined_call_operand.vmem [shape: f32[64,4], index: 1, kind: input, shape index: {}]   ;;  %s1150_s2 = inlined_call_operand.vmem [shape: f32[1,4], index: 2, kind: input, shape index: {}]   ;;  %s1151_s3 = inlined_call_operand.vmem [shape: f32[4,64], index: 3, kind: input, shape index: {}]   ;;  %s1152_s4 = inlined_call_operand.vmem [shape: f32[1,64], index: 4, kind: input, shape index: {}]   ;;  %s1153_s5 = inlined_call_operand.hbm [shape: f32[2,64,64], index: 5, kind: output, shape index: {}]  }
   0x1   :  { %12 = vsyncpa [#allocation3 + $0x1], 0 }
   0x2   :  { %13 = vsyncpa [#allocation4], 0 }
   0x3   :  { %15 = vsyncpa [#allocation4 + $0x1], 0  ;;  %s897_s18 = smov 0   ;;  %s899_s19 = smov 0  }
   0x4   :  { %s901_s20 = smov 0   ;;  %s903_s21 = smov 0  }
   0x5 LB: > { %s918_s22 = sadd.s32 4294967295, %s857_s21   ;;  %s654_s23 = sadd.s32 4294967294, %s857_s21   ;;  %s857_s21 = sphi %s903_s21, %s1168_s21   ;;  %s853_s20 = sphi %s901_s20, %s1167_s20   ;;  %s849_s19 = sphi %s899_s19, %s1166_s19   ;;  %s845_s18 = sphi %s897_s18, %s1165_s18  }
   0x6   : > { %s922_s24 = sadd.s32 1, %s857_s21   ;;  %s28_s25 = sadd.s32 1, %s853_s20 }
   0x7   : > { %s25_s26 = ssub.s32 %s857_s21, %s922_s24  ;;  %p35_p0 = scmp.ne.s32.totalorder %s853_s20, %s849_s19 }
   0x8   : > { %p26_p1 = scmp.eq.s32.totalorder %s25_s26, 0  ;;  %p36_p2 = scmp.eq.s32.totalorder %s857_s21, 0 }
   0x9   : > { %p41_p3 = scmp.ne.s32.totalorder %s849_s19, %s845_s18  ;;  %p42_p4 = scmp.eq.s32.totalorder %s918_s22, 0 }
   0xa   : > { %s934_s27 = scalar_select %p26_p1, %s853_s20, %s28_s25  }
   0xb   : > { %p936_p5 = por %p36_p2, %p35_p0  ;;  %p940_p6 = por %p42_p4, %p41_p3 }
   0xc   : > { %p149_p7 = scmp.eq.s32.totalorder %s918_s22, 1  ;;  %p155_p8 = scmp.eq.s32.totalorder %s654_s23, 1 }
   0xd   : > { %s1157_s29 = scalar_select %p940_p6, 1, 0 }
   0xe   : > { %p721_p10 = scmp.lt.s32.totalorder %s857_s21, 2  ;;  %p947_p11 = por %p149_p7, %p35_p0 }
   0xf   : > { %p951_p12 = por %p155_p8, %p41_p3  ;;  %s187_s7 = sand.u32 1, %s853_s20  }
  0x10   : > { %s1158_s30 = scalar_select %p947_p11, 1, 0 }
  0x11   : > { %s1159_s6 = scalar_select %p951_p12, 1, 0 }
  0x12   : > { %s672_s8 = sshll.u32 %s857_s21, 10  ;;  %s657_s9 = sshll.u32 %s187_s7, 6 }
  0x13   : > { %s960_s12 = scalar_lea.hbm %s1148_s0, %s672_s8  ;;  %s191_s13 = scalar_lea.vmem [#allocation2], %s657_s9 }
  0x14   : > { %s198_s14 = sshll.u32 %s191_s13, 4  ;;  %p964_p13 = pnand %p721_p10, %p936_p5  ;;  %s968_s14 = int_to_ptr.vmem [resolvable:$true] %s198_s14 }
  0x15   : > { %s970_s16 = scalar_lea.sflag [#allocation3], %s187_s7  ;;  %s765_s17 = scalar_lea.hbm %s960_s12, 1024 }
  0x16   : > { %p766_p0 = scmp.ne.s32.totalorder %s960_s12, %s765_s17  ;;  %p767_p1 = pneg %p964_p13 }
  0x17   : > { %s770_s26 = scalar_lea.hbm %s1148_s0, 2048  ;;  %p771_p4 = scmp.lt.s32.totalorder %s960_s12, %s1148_s0 }
  0x18   : > { %p768_p2 = pnand %p767_p1, %p766_p0  ;;  %p772_p5 = scmp.lt.s32.totalorder %s770_s26, %s765_s17 }
  0x1a   : > { %p769_p3 = pneg %p768_p2  ;;  %p773_p7 = por %p772_p5, %p771_p4 }
  0x1c   : > { %p774_p8 = pnand %p773_p7, %p769_p3 }
  0x1e   : > { %777 = shalt.err (!%p774_p8)
}
  0x1f   : > { %s778_s7 = scalar_lea.vmem %s968_s14, 1024  ;;  %s859_s9 = smov [#allocation2]  }
  0x20   : > { %p779_p10 = scmp.ne.s32.totalorder %s968_s14, %s778_s7  ;;  %s783_s10 = sshll.u32 %s859_s9, 4  ;;  %s784_s10 = int_to_ptr.vmem [resolvable:$false] %s783_s10 }
  0x21   : > { %s785_s11 = scalar_lea.vmem %s784_s10, 2048  ;;  %p786_p2 = scmp.lt.s32.totalorder %s968_s14, %s784_s10 }
  0x22   : > { %p781_p9 = pnand %p779_p10, %p767_p1  ;;  %p787_p12 = scmp.lt.s32.totalorder %s785_s11, %s778_s7 }
  0x24   : > { %p782_p0 = pneg %p781_p9  ;;  %p788_p11 = por %p787_p12, %p786_p2 }
  0x26   : > { %p789_p6 = pnand %p788_p11, %p782_p0 }
  0x28   : > { %792 = shalt.err (!%p789_p6)
}
  0x29   : > { %s860_s13 = smov 128   ;;  %s861_s17 = smov 8  }
  0x2a   : > { %716 = dma.hbm_to_vmem [thread:$0]  (!%p964_p13), %s960_s12, 1024, %s968_s14, %s970_s16, %s860_s13, %s860_s13, %s861_s17  }
  0x2b   : > { %p660_p9 = scmp.ge.s32.totalorder %s857_s21, 1  ;;  %p206_p1 = scmp.lt.s32.totalorder %s857_s21, 3 }
  0x2d   : > { %p207_p3 = pnand %p660_p9, %p206_p1 }
  0x2e   : > { %s994_s23 = sand.u32 (!%p207_p3), 1, %s849_s19   ;;  %p1161_p6 = scmp.ne.s32.totalorder (!%p207_p3), %s1157_s29, 0 }
  0x2f   : > { %210 = sbr.rel (%p207_p3) target bundleno = 784 (0x310), region = 40  ;;  %s661_s25 = sshll.u32 (!%p207_p3), %s994_s23, 6 }
  0x30   : > { %s213_s26 = scalar_lea.sflag (!%p207_p3), [#allocation3], %s994_s23  ;;  %s216_s28 = scalar_lea.vmem (!%p207_p3), [#allocation2], %s661_s25 }
  0x34   : > { %836 = dma.done.wait (%p1161_p6), %s213_s26, 1024  }
  0x35   : > { %838 = vsyncadd (%p1161_p6), %s213_s26, 4294966272  ;;  %vm251_vm0 = vcmask 523264   ;;  %v1004_v0 = vld [vmem:[%s216_s28] sm:$0xff]  ;;  %v1006_v1 = vld [vmem:[%s216_s28 + $0x10] sm:$0xff]  ;;  %v862_v17 = vmov 0.0   ;;  %vm863_vm1 = vmmov 0   ;;  %v302_v25 = vlaneseq }
  0x36   : > { %v1008_v2 = vld [vmem:[%s216_s28 + $0x8] sm:$0xff]  ;;  %v252_v3 = vsel %vm251_vm0, %v1004_v0, 0.0  ;;  %v258_v4 = vsel %vm251_vm0, %v1006_v1, 0.0  ;;  %v1014_v5 = vld [vmem:[%s216_s28 + $0x18] sm:$0xff]  ;;  %v1020_v8 = vld [vmem:[%s216_s28 + $0x20] sm:$0xff]  ;;  %685 = vmatprep.subr.mxu0 %v862_v17  ;;  %704 = vmatprep.subr.mxu1 %v862_v17  ;;  %vm313_vm2 = vcmask 130112  }
  0x37   : > { %253 = vadd.xlane.f32.xlu0 %v252_v3  ;;  %259 = vadd.xlane.f32.xlu1 %v258_v4  ;;  %v255_v6 = vsel %vm251_vm0, %v1008_v2, 0.0  ;;  %v261_v7 = vsel %vm251_vm0, %v1014_v5, 0.0  ;;  %v1022_v9 = vld [vmem:[%s216_s28 + $0x28] sm:$0xff]  ;;  %v264_v10 = vsel %vm251_vm0, %v1020_v8, 0.0  ;;  %v1028_v12 = vld [vmem:[%s216_s28 + $0x30] sm:$0xff]  ;;  %v1030_v13 = vld [vmem:[%s216_s28 + $0x38] sm:$0xff] }
  0x38   : > { %v267_v11 = vsel %vm251_vm0, %v1022_v9, 0.0  ;;  %v270_v14 = vsel %vm251_vm0, %v1028_v12, 0.0  ;;  %v273_v15 = vsel %vm251_vm0, %v1030_v13, 0.0  ;;  %v292_v16 = vld [vmem:[%s1149_s1 + $0x38] sm:$0xff]  ;;  %v291_v18 = vld [vmem:[%s1149_s1 + $0x30] sm:$0xff]  ;;  %v290_v19 = vld [vmem:[%s1149_s1 + $0x28] sm:$0xff]  ;;  %701 = vmatprep.mubr.msk.f32.mxu0 %vm863_vm1, %v862_v17  ;;  %706 = vmatprep.mubr.msk.f32.mxu1 %vm863_vm1, %v862_v17 }
  0x39   : > { %686 = vmatpush3.msra.mxu0 %v292_v16  ;;  %v289_v20 = vld [vmem:[%s1149_s1 + $0x20] sm:$0xff]  ;;  %v288_v21 = vld [vmem:[%s1149_s1 + $0x18] sm:$0xff]  ;;  %v287_v22 = vld [vmem:[%s1149_s1 + $0x10] sm:$0xff]  ;;  %v303_v26 = vand.u32 127, %v302_v25  ;;  %v1060_v27 = vshrl.u32 %v302_v25, 7  ;;  %vm320_vm3 = vcmask 195712  }
  0x3a   : > { %687 = vmatprep.subr.mxu0 %v862_v17  ;;  %v286_v23 = vld [vmem:[%s1149_s1 + $0x8] sm:$0xff]  ;;  %v285_v24 = vld [vmem:[%s1149_s1] sm:$0xff]  ;;  %vm327_vm4 = vcmask 261312   ;;  %vm334_vm5 = vcmask 326912   ;;  %vm341_vm6 = vcmask 392512   ;;  %vm348_vm7 = vcmask 458112  }
  0x3b   : > { %256 = vadd.xlane.f32.xlu0 %v255_v6  ;;  %262 = vadd.xlane.f32.xlu1 %v261_v7  ;;  %v308_v28 = vadd.s32 4294967288, %v303_v26  ;;  %v322_v29 = vadd.s32 4294967272, %v303_v26  ;;  %v315_v31 = vadd.s32 4294967280, %v303_v26  ;;  %v329_v33 = vadd.s32 4294967264, %v303_v26  ;;  %s242_s10 = scalar_lea.vmem [#allocation5], %s661_s25  ;;  %s673_s25 = sshll.u32 %s918_s22, 10 }
  0x3c   : > { %688 = vmatpush3.msra.mxu0 %v291_v18  ;;  %v306_v34 = vsub.s32 %v303_v26, %v1060_v27  ;;  %v336_v42 = vadd.s32 4294967256, %v303_v26  ;;  %v343_v46 = vadd.s32 4294967248, %v303_v26  ;;  %v350_v50 = vadd.s32 4294967240, %v303_v26  ;;  %v430_v18 = vld [vmem:[%s1151_s3] sm:$0xf]  ;;  %s581_s11 = sshll.u32 %s242_s10, 4  ;;  %s1101_s26 = scalar_lea.hbm %s1153_s5, %s673_s25  ;;  %s1103_s11 = int_to_ptr.vmem [resolvable:$true] %s581_s11 }
  0x3d   : > { %689 = vmatprep.subr.mxu0 %v862_v17  ;;  %v311_v36 = vsub.s32 %v308_v28, %v1060_v27  ;;  %v325_v37 = vsub.s32 %v322_v29, %v1060_v27  ;;  %v318_v38 = vsub.s32 %v315_v31, %v1060_v27  ;;  %v332_v45 = vsub.s32 %v329_v33, %v1060_v27  ;;  %s568_s28 = scalar_lea.sflag [#allocation4], %s994_s23  ;;  %s793_s22 = scalar_lea.vmem %s1103_s11, 1024 }
  0x3e   : > { %690 = vmatpush3.msra.mxu0 %v290_v19  ;;  %v339_v53 = vsub.s32 %v336_v42, %v1060_v27  ;;  %v346_v61 = vsub.s32 %v343_v46, %v1060_v27  ;;  %v353_v62 = vsub.s32 %v350_v50, %v1060_v27  ;;  %vm355_vm8 = vcmask 523712   ;;  %v293_v19 = vld [vmem:[%s1150_s2] sm:$0x1]  ;;  %p794_p11 = scmp.ne.s32.totalorder %s1103_s11, %s793_s22  ;;  %p1162_p12 = scmp.ne.s32.totalorder %s1158_s30, 0 }
  0x3f   : > { %265 = vadd.xlane.f32.xlu0 %v264_v10  ;;  %268 = vadd.xlane.f32.xlu1 %v267_v11  ;;  %vm436_vm9 = vcmask 1043456   ;;  %vm432_vm10 = vcmask 31744   ;;  %s864_s29 = smov [#allocation5]  }
  0x40   : > { %691 = vmatprep.subr.mxu0 %v862_v17  ;;  %705 = vmatpush3.msk.msra.mxu1 %vm436_vm9, %v430_v18  ;;  %p795_p13 = pnand %p794_p11, %p1162_p12  ;;  %s797_s12 = sshll.u32 %s864_s29, 4  ;;  %s798_s12 = int_to_ptr.vmem [resolvable:$false] %s797_s12 }
  0x41   : > { %692 = vmatpush3.msra.mxu0 %v289_v20  ;;  %s799_s14 = scalar_lea.vmem %s798_s12, 2048  ;;  %p800_p5 = scmp.lt.s32.totalorder %s1103_s11, %s798_s12 }
  0x42   : > { %693 = vmatprep.subr.mxu0 %v862_v17  ;;  %p796_p4 = pneg %p795_p13  ;;  %p801_p7 = scmp.lt.s32.totalorder %s799_s14, %s793_s22 }
  0x43   : > { %271 = vadd.xlane.f32.xlu0 %v270_v14  ;;  %274 = vadd.xlane.f32.xlu1 %v273_v15 }
  0x44   : > { %694 = vmatpush3.msra.mxu0 %v288_v21  ;;  %p802_p8 = por %p801_p7, %p800_p5 }
  0x45   : > { %695 = vmatprep.subr.mxu0 %v862_v17 }
  0x46   : > { %696 = vmatpush3.msra.mxu0 %v287_v22  ;;  %p803_p10 = pnand %p802_p8, %p796_p4 }
  0x47   : > { %697 = vmatprep.subr.mxu0 %v862_v17 }
  0x48   : > { %698 = vmatpush3.msra.mxu0 %v286_v23 }
  0x49   : > { %699 = vmatprep.subr.mxu0 %v862_v17 }
  0x4a   : > { %700 = vmatpush3.msra.mxu0 %v285_v24  ;;  %v431_v24 = vld [vmem:[%s1152_s4] sm:$0x1] }
  0xc0   : > { %v254_v30 = vpop.xlane.xlu0 %253  ;;  %v260_v32 = vpop.xlane.xlu1 %259 }
  0xc1   : > { %v277_v35 = vmul.f32 0.015625, %v254_v30  ;;  %v279_v39 = vmul.f32 0.015625, %v260_v32  ;;  %v518_v32 = vsub.s32 0, %v1060_v27 }
  0xc3   : > { %v307_v47 = vrot.slane %v277_v35, %v306_v34  ;;  %v319_v51 = vrot.slane %v279_v39, %v318_v38 }
  0xc4   : > { %v257_v40 = vpop.xlane.xlu0 %256  ;;  %v263_v41 = vpop.xlane.xlu1 %262 }
  0xc5   : > { %v278_v43 = vmul.f32 0.015625, %v257_v40  ;;  %v280_v44 = vmul.f32 0.015625, %v263_v41 }
  0xc7   : > { %v312_v48 = vrot.slane %v278_v43, %v311_v36  ;;  %v326_v49 = vrot.slane %v280_v44, %v325_v37 }
  0xc8   : > { %v266_v52 = vpop.xlane.xlu0 %265  ;;  %v269_v54 = vpop.xlane.xlu1 %268 }
  0xc9   : > { %v314_v55 = vsel %vm313_vm2, %v312_v48, %v307_v47  ;;  %v281_v56 = vmul.f32 0.015625, %v266_v52  ;;  %v282_v57 = vmul.f32 0.015625, %v269_v54 }
  0xca   : > { %v321_v58 = vsel %vm320_vm3, %v319_v51, %v314_v55 }
  0xcb   : > { %v328_v59 = vsel %vm327_vm4, %v326_v49, %v321_v58  ;;  %v333_v60 = vrot.slane %v281_v56, %v332_v45  ;;  %v340_v63 = vrot.slane %v282_v57, %v339_v53 }
  0xcc   : > { %v272_v3 = vpop.xlane.xlu0 %271  ;;  %v275_v4 = vpop.xlane.xlu1 %274 }
  0xcd   : > { %v335_v6 = vsel %vm334_vm5, %v333_v60, %v328_v59  ;;  %v283_v7 = vmul.f32 0.015625, %v272_v3  ;;  %v284_v10 = vmul.f32 0.015625, %v275_v4 }
  0xce   : > { %v342_v15 = vsel %vm341_vm6, %v340_v63, %v335_v6 }
  0xcf   : > { %v347_v11 = vrot.slane %v283_v7, %v346_v61  ;;  %v354_v14 = vrot.slane %v284_v10, %v353_v62 }
  0xd1   : > { %v349_v16 = vsel %vm348_vm7, %v347_v11, %v342_v15 }
  0xd2   : > { %v356_v17 = vsel %vm355_vm8, %v354_v14, %v349_v16 }
  0xd3   : > { %702 = vmatmul.mubr.msk.f32.vlgmr.msra.gmra.mxu0 %vm251_vm0, %v356_v17 }
 0x193   : > { %v425_v20 = vpop.f32.mrf.mxu0 }
 0x194   : > { %v426_v21 = vadd.f32 %v425_v20, %v293_v19 }
 0x195   : > { %v703_v22 = vpop.f32.mrf.mxu0 }
 0x196   : > { %v429_v23 = vmax.f32 %v426_v21, 0.0 }
 0x198   : > { %707 = vmatmul.mubr.msk.f32.vlgmr.msra.gmra.mxu1 %vm432_vm10, %v429_v23 }
 0x258   : > { %v506_v25 = vpop.f32.mrf.mxu1 }
 0x259   : > { %v507_v26 = vadd.f32 %v506_v25, %v431_v24 }
 0x25a   : > { %v708_v28 = vpop.f32.mrf.mxu1 }
 0x25b   : > { %v666_v29 = vmul.f32 -1.442695, %v507_v26 }
 0x25d   : > { %761 = vpow2.f32 %v666_v29 }
 0x26a   : > { %v762_v30 = vpop.eup %761 }
 0x26b   : > { %v513_v31 = vadd.f32 1.0, %v762_v30 }
 0x26d   : > { %763 = vrcp.f32 %v513_v31 }
 0x27a   : > { %v764_v33 = vpop.eup %763 }
 0x27b   : > { %v519_v34 = vrot.slane %v764_v33, %v518_v32 }
 0x27d   : > { %525 = vbcast.lane.b32.xlu1 %v519_v34, 264  ;;  %521 = vbcast.lane.b32.xlu0 %v519_v34, 256 }
 0x281   : > { %529 = vbcast.lane.b32.xlu1 %v519_v34, 272  ;;  %537 = vbcast.lane.b32.xlu0 %v519_v34, 288 }
 0x285   : > { %533 = vbcast.lane.b32.xlu1 %v519_v34, 280  ;;  %545 = vbcast.lane.b32.xlu0 %v519_v34, 304 }
 0x289   : > { %541 = vbcast.lane.b32.xlu1 %v519_v34, 296 }
 0x28d   : > { %549 = vbcast.lane.b32.xlu1 %v519_v34, 312 }
 0x2ef   : > { %v526_v35 = vpop.permute.xlu1 %525  ;;  %v522_v36 = vpop.permute.xlu0 %521 }
 0x2f0   : > { %v552_v37 = vmul.f32 %v526_v35, %v1008_v2  ;;  %v551_v38 = vmul.f32 %v522_v36, %v1004_v0 }
 0x2f2   : > { %560 = vst.msk [vmem:[%s242_s10 + $0x8] sm:$0xff] %vm251_vm0, %v552_v37  ;;  %559 = vst.msk [vmem:[%s242_s10] sm:$0xff] %vm251_vm0, %v551_v38 }
 0x2f3   : > { %v530_v27 = vpop.permute.xlu1 %529  ;;  %v538_v39 = vpop.permute.xlu0 %537 }
 0x2f4   : > { %v553_v40 = vmul.f32 %v530_v27, %v1006_v1  ;;  %v555_v41 = vmul.f32 %v538_v39, %v1020_v8 }
 0x2f6   : > { %561 = vst.msk [vmem:[%s242_s10 + $0x10] sm:$0xff] %vm251_vm0, %v553_v40  ;;  %563 = vst.msk [vmem:[%s242_s10 + $0x20] sm:$0xff] %vm251_vm0, %v555_v41 }
 0x2f7   : > { %v534_v2 = vpop.permute.xlu1 %533  ;;  %v546_v0 = vpop.permute.xlu0 %545 }
 0x2f8   : > { %v554_v42 = vmul.f32 %v534_v2, %v1014_v5  ;;  %v557_v43 = vmul.f32 %v546_v0, %v1028_v12 }
 0x2fa   : > { %562 = vst.msk [vmem:[%s242_s10 + $0x18] sm:$0xff] %vm251_vm0, %v554_v42  ;;  %565 = vst.msk [vmem:[%s242_s10 + $0x30] sm:$0xff] %vm251_vm0, %v557_v43 }
 0x2fb   : > { %v542_v44 = vpop.permute.xlu1 %541 }
 0x2fc   : > { %v556_v1 = vmul.f32 %v542_v44, %v1022_v9 }
 0x2fe   : > { %564 = vst.msk [vmem:[%s242_s10 + $0x28] sm:$0xff] %vm251_vm0, %v556_v1 }
 0x2ff   : > { %v550_v8 = vpop.permute.xlu1 %549 }
 0x300   : > { %v558_v5 = vmul.f32 %v550_v8, %v1030_v13 }
 0x302   : > { %566 = vst.msk [vmem:[%s242_s10 + $0x38] sm:$0xff] %vm251_vm0, %v558_v5 }
 0x303   : > { %806 = shalt.err (!%p803_p10)
}
 0x304   : > { %s807_s15 = scalar_lea.hbm %s1101_s26, 1024  ;;  %s811_s7 = scalar_lea.hbm %s1153_s5, 2048 }
 0x305   : > { %p808_p0 = scmp.ne.s32.totalorder %s1101_s26, %s807_s15  ;;  %p812_p1 = scmp.lt.s32.totalorder %s1101_s26, %s1153_s5 }
 0x306   : > { %p813_p3 = scmp.lt.s32.totalorder %s811_s7, %s807_s15 }
 0x307   : > { %p809_p2 = pnand %p808_p0, %p1162_p12 }
 0x308   : > { %p814_p6 = por %p813_p3, %p812_p1 }
 0x309   : > { %p810_p9 = pneg %p809_p2 }
 0x30b   : > { %p815_p11 = pnand %p814_p6, %p810_p9 }
 0x30d   : > { %818 = shalt.err (!%p815_p11)
}
 0x30e   : > { %s865_s25 = smov 128   ;;  %s866_s13 = smov 8  }
 0x30f   : > { %711 = dma.vmem_to_hbm [thread:$0]  (%p1162_p12), %s1103_s11, 1024, %s1101_s26, %s568_s28, %s865_s25, %s865_s25, %s866_s13  }
 0x310 PF: > { %s596_s17 = sand.u32 1, %s845_s18   ;;  %p1163_p13 = scmp.ne.s32.totalorder %s1159_s6, 0 }
 0x311   : > { %p1164_p4 = scmp.ge.s32.totalorder %s857_s21, 2  ;;  %s597_s22 = scalar_lea.sflag [#allocation4], %s596_s17 }
 0x313   : > { %p718_p5 = pnand %p1164_p4, %p1163_p13 }
 0x315   : > { %p719_p7 = pneg %p718_p5 }
 0x317   : > { %840 = dma.done.wait (%p719_p7), %s597_s22, 1024  }
 0x318   : > { %842 = vsyncadd (%p719_p7), %s597_s22, 4294966272  ;;  %p18_p8 = scmp.ge.s32.totalorder %s922_s24, 4   ;;  %s1165_s18 = smov %s849_s19 }
 0x319   : > { %s1166_s19 = smov %s853_s20  ;;  %s1167_s20 = smov %s934_s27 }
 0x31a   : > { %s1168_s21 = smov %s922_s24  ;;  %20 = sbr.rel (!%p18_p8) target bundleno = 5 (0x5), region = 85 }
 0x31f   :  { %602 = vsyncpa [#allocation3], 1 }
 0x320   :  { %604 = vsyncpa [#allocation3 + $0x1], 1 }
 0x321   :  { %605 = vsyncpa [#allocation4], 1 }
 0x322   :  { %607 = vsyncpa [#allocation4 + $0x1], 1 }

</bundles_post_ra>
